<compile_context>
chip_gen: v7x
topology: tpu7x:2x2x1
jax: 0.10.0
libtpu: 0.0.40
codegen_flags: <defaults>
</compile_context>

<pallas_src>
import jax
import jax.numpy as jnp
from jax.experimental import pallas as pl
from jax.experimental.pallas import tpu as pltpu


def _make_kernel(C, TN, tail, use_l2, fuse):
    dims = (((1,), (1,)), ((), ()))     # X @ X^T : contract the pixel axis
    needs_mask = tail != TN

    def _scales(g):
        # diag(G)[i] = ||x_i||^2  ->  rsqrt column / row scale vectors.
        k = g.shape[0]
        row = jax.lax.broadcasted_iota(jnp.int32, (k, k), 0)
        col = jax.lax.broadcasted_iota(jnp.int32, (k, k), 1)
        gd = jnp.where(row == col, g, 0.0)
        r_col = jax.lax.rsqrt(jnp.sum(gd, axis=1, keepdims=True))   # (k, 1)
        r_row = jax.lax.rsqrt(jnp.sum(gd, axis=0, keepdims=True))   # (1, k)
        return r_col, r_row

    def kernel(det_ref, sr_ref, out_ref, *scratch):
        n = pl.program_id(1)
        last = pl.num_programs(1) - 1

        @pl.when(n == 0)
        def _():
            for ref in scratch:
                ref[...] = jnp.zeros_like(ref)

        def accumulate(x, y):
            if fuse:
                (acc_ref,) = scratch
                xy = jnp.concatenate([x, y], axis=0)                 # (2C, TN)
                acc_ref[...] += jax.lax.dot_general(
                    xy, xy, dims, preferred_element_type=jnp.float32)
            else:
                gx_ref, gy_ref = scratch
                gx_ref[...] += jax.lax.dot_general(
                    x, x, dims, preferred_element_type=jnp.float32)
                gy_ref[...] += jax.lax.dot_general(
                    y, y, dims, preferred_element_type=jnp.float32)

        x = det_ref[0]      # (C, TN), input dtype (f32 or bf16)
        y = sr_ref[0]

        if needs_mask:
            # Tail columns of the last tile are out of bounds: zero them so
            # they add nothing to the grams or the channel norms (exact).
            @pl.when(n < last)
            def _():
                accumulate(x, y)

            @pl.when(n == last)
            def _():
                lane = jax.lax.broadcasted_iota(jnp.int32, (C, TN), 1)
                keep = lane < tail
                zero = jnp.zeros_like(x)
                accumulate(jnp.where(keep, x, zero), jnp.where(keep, y, zero))
        else:
            accumulate(x, y)

        @pl.when(n == last)
        def _():
            if fuse:
                acc = scratch[0][...]                                # (2C, 2C)
                r_col, r_row = _scales(acc)
                d = (acc[:C, :C] * (r_col[:C] * r_row[:, :C])
                     - acc[C:, C:] * (r_col[C:] * r_row[:, C:]))
            else:
                gx = scratch[0][...]
                gy = scratch[1][...]
                rxc, rxr = _scales(gx)
                ryc, ryr = _scales(gy)
                d = gx * (rxc * rxr) - gy * (ryc * ryr)
            contrib = jnp.sum(d * d) if use_l2 else jnp.sum(jnp.abs(d))
            out_ref[...] = jnp.broadcast_to(contrib, out_ref.shape)

    return kernel


def _mxu_width():
    try:
        kind = jax.devices()[0].device_kind.lower()
    except Exception:
        return 128
    return 256 if ("v6" in kind or "v7" in kind) else 128


def _vmem_capacity_bytes():
    try:
        return int(pltpu.get_tpu_info().vmem_capacity_bytes)
    except Exception:
        return 64 * 1024 * 1024          # safe lower bound (v7x per-TC VMEM)


def fa_loss_v2_pallas(det, sr, *, use_subsample=True, use_l2=False,
                      reduction="mean", loss_weight=1.0):
    """Feature Affinity loss v2 (normalized channel-gram matrices)."""
    assert det.shape == sr.shape
    assert reduction in ("none", "sum", "mean")

    if use_subsample:
        # F.interpolate(scale_factor=1/8, mode='nearest'): out = floor(in/8),
        # src = 8*dst.  The slice below reproduces that exactly, including
        # H, W not divisible by 8.
        # TODO(synk): fold this strided row pick into the kernel's own DMA
        # (memory_space=pl.ANY + stride-8 copies) to skip the gather pass.
        _, _, H0, W0 = det.shape
        Hs, Ws = H0 // 8, W0 // 8
        det = det[:, :, : Hs * 8 : 8, : Ws * 8 : 8]
        sr = sr[:, :, : Hs * 8 : 8, : Ws * 8 : 8]

    B, C, H, W = det.shape
    N = H * W

    # bf16 feeds the MXU directly (f32 accumulation); promote odd dtypes only.
    if det.dtype not in (jnp.dtype(jnp.bfloat16), jnp.dtype(jnp.float32)):
        det = det.astype(jnp.float32)
        sr = sr.astype(jnp.float32)
    det2 = det.reshape(B, C, N)
    sr2 = sr.reshape(B, C, N)
    itemsize = det2.dtype.itemsize

    # Fuse both grams into one stacked (2C, TN) matmul only when 2C fits one
    # MXU tile on this generation (v5e-class: 128 wide, v6e/v7x: 256 wide).
    fuse = 2 * C <= _mxu_width()

    # --- adaptive pixel tile, sized against a per-generation VMEM budget ----
    vmem_cap = _vmem_capacity_bytes()
    budget = min(max(vmem_cap - 16 * 1024 * 1024, 24 * 1024 * 1024),
                 112 * 1024 * 1024)

    acc_bytes = ((2 * C) * (2 * C) if fuse else 2 * C * C) * 4
    fixed = 4 * acc_bytes + 64 * 1024 + (4 << 20)  # acc + epilogue temps + slack
    per_tn = 2 * 2 * C * itemsize                  # 2 inputs x 2 pipeline bufs
    if fuse:
        per_tn += 2 * (2 * C) * itemsize           # stacked concat temporary
    per_tn += C * (4 + 2 * itemsize)               # last-tile mask temporaries

    tn_pref = max(-(-(2 * 1024 * 1024) // (C * itemsize)), 512)  # ~2 MiB block
    tn_cap = max((budget - fixed) // per_tn, 128)
    TN = min(N, tn_pref, tn_cap)

    if TN >= N:
        TN, NT = N, 1
    else:
        TN = max((TN // 128) * 128, 128)
        # Prefer a tile that divides N exactly (skips the last-tile masking).
        for cand in range(TN, max(TN // 2, 128) - 1, -128):
            if N % cand == 0:
                TN = cand
                break
        NT = -(-N // TN)
    tail = N - (NT - 1) * TN

    scratch_shapes = ([pltpu.VMEM((2 * C, 2 * C), jnp.float32)] if fuse else
                      [pltpu.VMEM((C, C), jnp.float32),
                       pltpu.VMEM((C, C), jnp.float32)])

    vmem_need = fixed + per_tn * TN
    vmem_limit = int(max(vmem_need, 32 * 1024 * 1024))
    vmem_limit = int(min(vmem_limit, vmem_cap - 4 * 1024 * 1024))

    cost = pl.CostEstimate(
        flops=int((8 if fuse else 4) * B * C * C * N),
        transcendentals=int(2 * B * C),
        bytes_accessed=int(2 * B * C * N * itemsize + B * 8 * 128 * 4),
    )

    # TODO(synk): when B == 1 on a 2-TensorCore part (v7x), split the pixel
    # reduction over a leading parallel grid axis and combine the partial
    # grams outside the kernel so both cores stay busy.
    out = pl.pallas_call(
        _make_kernel(C, TN, tail, use_l2, fuse),
        out_shape=jax.ShapeDtypeStruct((B, 8, 128), jnp.float32),
        grid_spec=pltpu.PrefetchScalarGridSpec(
            num_scalar_prefetch=0,
            grid=(B, NT),
            in_specs=[
                pl.BlockSpec((1, C, TN), lambda b, n: (b, 0, n)),
                pl.BlockSpec((1, C, TN), lambda b, n: (b, 0, n)),
            ],
            out_specs=pl.BlockSpec((1, 8, 128), lambda b, n: (b, 0, 0)),
            scratch_shapes=scratch_shapes,
        ),
        compiler_params=pltpu.CompilerParams(
            dimension_semantics=("parallel", "arbitrary"),
            vmem_limit_bytes=vmem_limit,
        ),
        cost_estimate=cost,
    )(det2, sr2)

    partials = out[:, 0, 0]                       # per-batch sum of |d| / d^2
    loss = jnp.sum(partials) / float(B * C * C)   # mean over the (B, C, C) grams
    # @weighted_loss with weight=None, avg_factor=None leaves an already-scalar
    # loss unchanged for reduction in {'mean', 'sum', 'none'}.
    return loss * loss_weight


def _fa_loss_v2_ref(det, sr, *, use_subsample=True, use_l2=False):
    """Pure-JAX reference mirroring the PyTorch code, for verification."""
    def norm_gram(feat):
        if use_subsample:
            _, _, H0, W0 = feat.shape
            Hs, Ws = H0 // 8, W0 // 8
            feat = feat[:, :, : Hs * 8 : 8, : Ws * 8 : 8]
        B, C, H, W = feat.shape
        F2 = feat.reshape(B, C, H * W).astype(jnp.float32)
        gram = jnp.einsum("bcn,bdn->bcd", F2, F2)
        norm = jnp.linalg.norm(F2, axis=2)                 # (B, C)
        norm_m = norm[:, :, None] * norm[:, None, :]
        return gram / norm_m

    a = norm_gram(det)
    b = norm_gram(sr)
    if use_l2:
        return jnp.mean((a - b) ** 2)
    return jnp.mean(jnp.abs(a - b))


if __name__ == "__main__":
    key = jax.random.PRNGKey(0)
    k1, k2, k3, k4 = jax.random.split(key, 4)

    # Small config matching the module's expected NCHW features (fused path).
    B, C, H, W = 2, 4, 16, 16
    det = jax.random.normal(k1, (B, C, H, W), dtype=jnp.float32)
    sr = jax.random.normal(k2, (B, C, H, W), dtype=jnp.float32)

    loss = fa_loss_v2_pallas(det, sr, use_subsample=True, use_l2=False,
                             reduction="mean", loss_weight=1.0)
    loss = jax.block_until_ready(loss)
    ref = _fa_loss_v2_ref(det, sr, use_subsample=True, use_l2=False)
    assert jnp.allclose(loss, ref, rtol=1e-5, atol=1e-6), (loss, ref)

    # Second config exercising the unfused (2C > MXU width) path and L2 branch.
    B2, C2, H2, W2 = 1, 160, 8, 8
    det_b = jax.random.normal(k3, (B2, C2, H2, W2), dtype=jnp.float32)
    sr_b = jax.random.normal(k4, (B2, C2, H2, W2), dtype=jnp.float32)
    loss2 = fa_loss_v2_pallas(det_b, sr_b, use_subsample=False, use_l2=True,
                              reduction="mean", loss_weight=1.0)
    loss2 = jax.block_until_ready(loss2)
    ref2 = _fa_loss_v2_ref(det_b, sr_b, use_subsample=False, use_l2=True)
    assert jnp.allclose(loss2, ref2, rtol=1e-4, atol=1e-6), (loss2, ref2)

    print("KERNEL_OK")
</pallas_src>

<mosaic_0001>
module attributes {stable_mosaic.version = 11 : i64} {
  func.func @kernel(%arg0: i32, %arg1: i32, %arg2: memref<1x4x4xf32, #tpu.memory_space<vmem>>, %arg3: memref<1x4x4xf32, #tpu.memory_space<vmem>>, %arg4: memref<1x8x128xf32, #tpu.memory_space<vmem>>, %arg5: memref<8x8xf32, #tpu.memory_space<vmem>>) attributes {dimension_semantics = [#tpu.dimension_semantics<parallel>, #tpu.dimension_semantics<arbitrary>], iteration_bounds = array<i64: 2, 1>, scalar_prefetch = 0 : i64, scratch_operands = 1 : i64, tpu.core_type = #tpu.core_type<tc>, window_params = [{transform_indices = @transform_0, window_bounds = array<i64: 1, 4, 4>}, {transform_indices = @transform_1, window_bounds = array<i64: 1, 4, 4>}, {transform_indices = @transform_2, window_bounds = array<i64: 1, 8, 128>}]} {
    %c0_i32 = arith.constant 0 : i32
    %0 = arith.cmpi eq, %arg1, %c0_i32 : i32
    %1 = arith.extui %0 : i1 to i32
    %c0_i32_0 = arith.constant 0 : i32
    %2 = arith.cmpi ne, %1, %c0_i32_0 : i32
    scf.if %2 {
      %cst_12 = arith.constant 0.000000e+00 : f32
      %15 = vector.broadcast %cst_12 : f32 to vector<8x8xf32>
      %c0_13 = arith.constant 0 : index
      %c0_14 = arith.constant 0 : index
      %16 = vector.load %arg5[%c0_13, %c0_14] : memref<8x8xf32, #tpu.memory_space<vmem>>, vector<8x8xf32>
      tpu.vector_store %arg5[%c0_13, %c0_14], %15 {strides = array<i32>} : memref<8x8xf32, #tpu.memory_space<vmem>>, vector<8x8xf32>,
    } else {
    }
    %c0 = arith.constant 0 : index
    %c0_1 = arith.constant 0 : index
    %c0_2 = arith.constant 0 : index
    %3 = vector.load %arg2[%c0, %c0_1, %c0_2] : memref<1x4x4xf32, #tpu.memory_space<vmem>>, vector<1x4x4xf32>
    %4 = vector.shape_cast %3 : vector<1x4x4xf32> to vector<4x4xf32>
    %c0_3 = arith.constant 0 : index
    %c0_4 = arith.constant 0 : index
    %c0_5 = arith.constant 0 : index
    %5 = vector.load %arg3[%c0_3, %c0_4, %c0_5] : memref<1x4x4xf32, #tpu.memory_space<vmem>>, vector<1x4x4xf32>
    %6 = vector.shape_cast %5 : vector<1x4x4xf32> to vector<4x4xf32>
    %7 = tpu.concatenate %4, %6 in 0 : vector<4x4xf32>, vector<4x4xf32> -> vector<8x4xf32>
    %c0_6 = arith.constant 0 : index
    %c0_7 = arith.constant 0 : index
    %8 = vector.load %arg5[%c0_6, %c0_7] : memref<8x8xf32, #tpu.memory_space<vmem>>, vector<8x8xf32>
    %cst = arith.constant dense<0.000000e+00> : vector<8x8xf32>
    %9 = tpu.matmul %7, %7, %cst {dimension_numbers = #tpu.dot_dimension_numbers<[1], [1], [0], [0], [0, 0, 1, 0], [], []>} : vector<8x4xf32>, vector<8x4xf32>, vector<8x8xf32> -> vector<8x8xf32>
    %10 = arith.addf %8, %9 : vector<8x8xf32>
    %c0_8 = arith.constant 0 : index
    %c0_9 = arith.constant 0 : index
    %11 = vector.load %arg5[%c0_8, %c0_9] : memref<8x8xf32, #tpu.memory_space<vmem>>, vector<8x8xf32>
    tpu.vector_store %arg5[%c0_8, %c0_9], %10 {strides = array<i32>} : memref<8x8xf32, #tpu.memory_space<vmem>>, vector<8x8xf32>,
    %c0_i32_10 = arith.constant 0 : i32
    %12 = arith.cmpi eq, %arg1, %c0_i32_10 : i32
    %13 = arith.extui %12 : i1 to i32
    %c0_i32_11 = arith.constant 0 : i32
    %14 = arith.cmpi ne, %13, %c0_i32_11 : i32
    scf.if %14 {
      %c0_12 = arith.constant 0 : index
      %c0_13 = arith.constant 0 : index
      %15 = vector.load %arg5[%c0_12, %c0_13] : memref<8x8xf32, #tpu.memory_space<vmem>>, vector<8x8xf32>
      %16 = tpu.iota {dimensions = array<i32: 0>} : vector<8x8xi32>
      %17 = tpu.iota {dimensions = array<i32: 1>} : vector<8x8xi32>
      %18 = arith.cmpi eq, %16, %17 : vector<8x8xi32>
      %cst_14 = arith.constant 0.000000e+00 : f32
      %19 = vector.broadcast %cst_14 : f32 to vector<8x8xf32>
      %20 = arith.select %18, %15, %19 : vector<8x8xi1>, vector<8x8xf32>
      %cst_15 = arith.constant dense<0.000000e+00> : vector<8xf32>
      %21 = vector.multi_reduction <add>, %20, %cst_15 [1] : vector<8x8xf32> to vector<8xf32>
      %22 = vector.shape_cast %21 : vector<8xf32> to vector<8x1xf32>
      %23 = math.rsqrt %22 : vector<8x1xf32>
      %cst_16 = arith.constant dense<0.000000e+00> : vector<8xf32>
      %24 = vector.multi_reduction <add>, %20, %cst_16 [0] : vector<8x8xf32> to vector<8xf32>
      %25 = vector.shape_cast %24 : vector<8xf32> to vector<1x8xf32>
      %26 = math.rsqrt %25 : vector<1x8xf32>
      %27 = vector.extract_strided_slice %15 {offsets = [0, 0], sizes = [4, 4], strides = [1, 1]} : vector<8x8xf32> to vector<4x4xf32>
      %28 = vector.extract_strided_slice %23 {offsets = [0, 0], sizes = [4, 1], strides = [1, 1]} : vector<8x1xf32> to vector<4x1xf32>
      %29 = vector.extract_strided_slice %26 {offsets = [0, 0], sizes = [1, 4], strides = [1, 1]} : vector<1x8xf32> to vector<1x4xf32>
      %30 = vector.broadcast %28 : vector<4x1xf32> to vector<4x4xf32>
      %31 = vector.broadcast %29 : vector<1x4xf32> to vector<4x4xf32>
      %32 = arith.mulf %30, %31 : vector<4x4xf32>
      %33 = arith.mulf %27, %32 : vector<4x4xf32>
      %34 = vector.extract_strided_slice %15 {offsets = [4, 4], sizes = [4, 4], strides = [1, 1]} : vector<8x8xf32> to vector<4x4xf32>
      %35 = vector.extract_strided_slice %23 {offsets = [4, 0], sizes = [4, 1], strides = [1, 1]} : vector<8x1xf32> to vector<4x1xf32>
      %36 = vector.extract_strided_slice %26 {offsets = [0, 4], sizes = [1, 4], strides = [1, 1]} : vector<1x8xf32> to vector<1x4xf32>
      %37 = vector.broadcast %35 : vector<4x1xf32> to vector<4x4xf32>
      %38 = vector.broadcast %36 : vector<1x4xf32> to vector<4x4xf32>
      %39 = arith.mulf %37, %38 : vector<4x4xf32>
      %40 = arith.mulf %34, %39 : vector<4x4xf32>
      %41 = arith.subf %33, %40 : vector<4x4xf32>
      %42 = math.absf %41 : vector<4x4xf32>
      %43 = vector.shape_cast %42 : vector<4x4xf32> to vector<1x4x4xf32>
      %cst_17 = arith.constant dense<0.000000e+00> : vector<1xf32>
      %44 = vector.multi_reduction <add>, %43, %cst_17 [1, 2] : vector<1x4x4xf32> to vector<1xf32>
      %45 = vector.shape_cast %44 : vector<1xf32> to vector<1x1x1xf32>
      %46 = vector.extract %45[0, 0, 0] : f32 from vector<1x1x1xf32>
      %47 = vector.broadcast %46 : f32 to vector<1x8x128xf32>
      %c0_18 = arith.constant 0 : index
      %c0_19 = arith.constant 0 : index
      %c0_20 = arith.constant 0 : index
      %48 = vector.load %arg4[%c0_18, %c0_19, %c0_20] : memref<1x8x128xf32, #tpu.memory_space<vmem>>, vector<1x8x128xf32>
      tpu.vector_store %arg4[%c0_18, %c0_19, %c0_20], %47 {strides = array<i32>} : memref<1x8x128xf32, #tpu.memory_space<vmem>>, vector<1x8x128xf32>,
    } else {
    }
    return
  }
  func.func @transform_0(%arg0: i32, %arg1: i32) -> (i32, i32, i32) {
    %c0_i32 = arith.constant 0 : i32
    %c0_i32_0 = arith.constant 0 : i32
    return %arg0, %c0_i32, %arg1 : i32, i32, i32
  }
  func.func @transform_1(%arg0: i32, %arg1: i32) -> (i32, i32, i32) {
    %c0_i32 = arith.constant 0 : i32
    %c0_i32_0 = arith.constant 0 : i32
    return %arg0, %c0_i32, %arg1 : i32, i32, i32
  }
  func.func @transform_2(%arg0: i32, %arg1: i32) -> (i32, i32, i32) {
    %c0_i32 = arith.constant 0 : i32
    %c0_i32_0 = arith.constant 0 : i32
    %c0_i32_1 = arith.constant 0 : i32
    return %arg0, %c0_i32, %c0_i32_0 : i32, i32, i32
  }
}

</mosaic_0001>

<bundles_post_ra>
// kernel: tpu_custom_call.1
= control target key start
LH: loop header
LB: loop body
LE: loop exit
PB: predicated region body
PF: predicated region fallthrough
CT: control target
= control target key end

     0   :  { %7 = vsyncpa [#allocation4], 0  ;;  %s959_s0 = inlined_call_operand.hbm [shape: f32[2,4,4], index: 0, kind: input, shape index: {}]   ;;  %s960_s1 = inlined_call_operand.hbm [shape: f32[2,4,4], index: 1, kind: input, shape index: {}]   ;;  %s961_s2 = inlined_call_operand.hbm [shape: f32[2,8,128], index: 2, kind: output, shape index: {}]  }
   0x1   :  { %9 = vsyncpa [#allocation4 + $0x1], 0 }
   0x2   :  { %10 = vsyncpa [#allocation7], 0 }
   0x3   :  { %12 = vsyncpa [#allocation7 + $0x1], 0 }
   0x4   :  { %13 = vsyncpa [#allocation5], 0 }
   0x5   :  { %15 = vsyncpa [#allocation5 + $0x1], 0  ;;  %s735_s9 = smov 0   ;;  %s737_s10 = smov 0  }
   0x6   :  { %s739_s11 = smov 0   ;;  %s741_s12 = smov 0  }
   0x7   :  { %s743_s13 = smov 0   ;;  %s745_s14 = smov 0  }
   0x8 LB: > { %s465_s15 = sadd.s32 4294967295, %s712_s14   ;;  %s466_s16 = sadd.s32 4294967294, %s712_s14   ;;  %s712_s14 = sphi %s745_s14, %s21_s14   ;;  %s708_s13 = sphi %s743_s13, %s981_s13   ;;  %s704_s12 = sphi %s741_s12, %s980_s12   ;;  %s700_s11 = sphi %s739_s11, %s979_s11   ;;  %s696_s10 = sphi %s737_s10, %s978_s10   ;;  %s692_s9 = sphi %s735_s9, %s977_s9  }
   0x9   : > { %s33_s17 = sadd.s32 1, %s708_s13  ;;  %s42_s18 = sadd.s32 1, %s700_s11 }
   0xa   : > { %p35_p0 = scmp.ge.s32.totalorder %s33_s17, 2  ;;  %p49_p1 = scmp.ne.s32.totalorder %s700_s11, %s696_s10 }
   0xb   : > { %p50_p2 = scmp.eq.s32.totalorder %s712_s14, 0  ;;  %p55_p3 = scmp.ne.s32.totalorder %s696_s10, %s692_s9 }
   0xc   : > { %s983_s17 = smov (%p35_p0, %s33_s17), 0  ;;  %p56_p5 = scmp.eq.s32.totalorder %s465_s15, 0 }
   0xd   : > { %p776_p4 = por %p50_p2, %p49_p1  ;;  %s37_s20 = ssub.s32 %s708_s13, %s983_s17 }
   0xe   : > { %p107_p6 = scmp.eq.s32.totalorder %s465_s15, 1  ;;  %p40_p7 = scmp.eq.s32.totalorder %s37_s20, 0 }
   0xf   : > { %p782_p8 = por %p56_p5, %p55_p3  ;;  %p113_p10 = scmp.eq.s32.totalorder %s466_s16, 1 }
  0x10   : > { %p786_p9 = por %p107_p6, %p49_p1  ;;  %p509_p13 = scmp.lt.s32.totalorder %s712_s14, 2 }
  0x11   : > { %s965_s21 = scalar_select %p782_p8, 1, 0 }
  0x12   : > { %s966_s22 = scalar_select %p786_p9, 1, 0 }
  0x13   : > { %s791_s23 = scalar_select %p40_p7, %s700_s11, %s42_s18  }
  0x14   : > { %p793_p11 = por %p113_p10, %p55_p3  ;;  %s800_s25 = sand.u32 1, %s700_s11  }
  0x15   : > { %s469_s26 = sshll.u32 %s800_s25, 2  ;;  %s470_s27 = sshll.u32 %s708_s13, 6 }
  0x16   : > { %s967_s24 = scalar_select %p793_p11, 1, 0 }
  0x17   : > { %s809_s30 = scalar_lea.hbm %s959_s0, %s470_s27  ;;  %s137_s3 = scalar_lea.vmem [#allocation3], %s469_s26 }
  0x18   : > { %s145_s4 = sshll.u32 %s137_s3, 4  ;;  %p817_p0 = pnand %p509_p13, %p776_p4  ;;  %s813_s4 = int_to_ptr.vmem [resolvable:$true] %s145_s4 }
  0x19   : > { %s134_s6 = scalar_lea.sflag [#allocation4], %s800_s25  ;;  %s566_s7 = scalar_lea.hbm %s809_s30, 64 }
  0x1a   : > { %p567_p3 = scmp.ne.s32.totalorder %s809_s30, %s566_s7  ;;  %p568_p5 = pneg %p817_p0 }
  0x1b   : > { %s571_s16 = scalar_lea.hbm %s959_s0, 128  ;;  %p572_p4 = scmp.lt.u32.totalorder %s809_s30, %s959_s0 }
  0x1c   : > { %p569_p6 = pnand %p568_p5, %p567_p3  ;;  %p573_p10 = scmp.lt.u32.totalorder %s571_s16, %s566_s7 }
  0x1d   : > { %p575_p12 = scmp.lt.u32.totalorder %s566_s7, %s809_s30 }
  0x1e   : > { %p570_p7 = pneg %p569_p6  ;;  %p574_p13 = por %p573_p10, %p572_p4 }
  0x20   : > { %p576_p1 = por %p575_p12, %p574_p13 }
  0x22   : > { %p577_p2 = pnand %p576_p1, %p570_p7 }
  0x24   : > { %580 = shalt.err (!%p577_p2)
}
  0x25   : > { %s581_s20 = scalar_lea.vmem %s813_s4, 64  ;;  %s714_s28 = smov [#allocation3]  }
  0x26   : > { %p582_p3 = scmp.ne.s32.totalorder %s813_s4, %s581_s20  ;;  %s586_s29 = sshll.u32 %s714_s28, 4  ;;  %s587_s29 = int_to_ptr.vmem [resolvable:$false] %s586_s29 }
  0x27   : > { %s588_s3 = scalar_lea.vmem %s587_s29, 128  ;;  %p589_p9 = scmp.lt.s32.totalorder %s813_s4, %s587_s29 }
  0x28   : > { %p584_p6 = pnand %p582_p3, %p568_p5  ;;  %p590_p4 = scmp.lt.s32.totalorder %s588_s3, %s581_s20 }
  0x2a   : > { %p585_p11 = pneg %p584_p6  ;;  %p591_p10 = por %p590_p4, %p589_p9 }
  0x2c   : > { %p592_p12 = pnand %p591_p10, %p585_p11 }
  0x2e   : > { %595 = shalt.err (!%p592_p12)
}
  0x2f   : > { %501 = dma.hbm_to_vmem [thread:$0]  (!%p817_p0), %s809_s30, 64, %s813_s4, %s134_s6  }
  0x30   : > { %p969_p1 = scmp.lt.s32.totalorder %s712_s14, 3  ;;  %p970_p2 = scmp.ge.s32.totalorder %s712_s14, 1 }
  0x31   : > { %s862_s16 = scalar_lea.hbm %s960_s1, %s470_s27  ;;  %s156_s18 = scalar_lea.vmem [#allocation6], %s469_s26 }
  0x32   : > { %p853_p7 = pnand %p970_p2, %p969_p1  ;;  %s164_s19 = sshll.u32 %s156_s18, 4  ;;  %s165_s19 = int_to_ptr.vmem [resolvable:$true] %s164_s19 }
  0x33   : > { %s153_s30 = scalar_lea.sflag [#allocation7], %s800_s25  ;;  %s596_s4 = scalar_lea.hbm %s862_s16, 64 }
  0x34   : > { %s971_s7 = scalar_select %p853_p7, 1, 0 }
  0x35   : > { %p597_p9 = scmp.ne.s32.totalorder %s862_s16, %s596_s4  ;;  %s601_s27 = scalar_lea.hbm %s960_s1, 128 }
  0x36   : > { %p602_p3 = scmp.lt.u32.totalorder %s862_s16, %s960_s1  ;;  %p603_p6 = scmp.lt.u32.totalorder %s601_s27, %s596_s4 }
  0x37   : > { %p599_p11 = pnand %p597_p9, %p568_p5  ;;  %p605_p10 = scmp.lt.u32.totalorder %s596_s4, %s862_s16 }
  0x38   : > { %p604_p4 = por %p603_p6, %p602_p3 }
  0x39   : > { %p600_p13 = pneg %p599_p11 }
  0x3a   : > { %p606_p12 = por %p605_p10, %p604_p4 }
  0x3c   : > { %p607_p1 = pnand %p606_p12, %p600_p13 }
  0x3e   : > { %610 = shalt.err (!%p607_p1)
}
  0x3f   : > { %s611_s25 = scalar_lea.vmem %s165_s19, 64  ;;  %s715_s26 = smov [#allocation6]  }
  0x40   : > { %p612_p2 = scmp.ne.s32.totalorder %s165_s19, %s611_s25  ;;  %s616_s3 = sshll.u32 %s715_s26, 4  ;;  %s617_s3 = int_to_ptr.vmem [resolvable:$false] %s616_s3 }
  0x41   : > { %s618_s8 = scalar_lea.vmem %s617_s3, 128  ;;  %p619_p8 = scmp.lt.s32.totalorder %s165_s19, %s617_s3 }
  0x42   : > { %p614_p9 = pnand %p612_p2, %p568_p5  ;;  %p620_p7 = scmp.lt.s32.totalorder %s618_s8, %s611_s25 }
  0x44   : > { %p615_p11 = pneg %p614_p9  ;;  %p621_p3 = por %p620_p7, %p619_p8 }
  0x46   : > { %p622_p6 = pnand %p621_p3, %p615_p11 }
  0x48   : > { %625 = shalt.err (!%p622_p6)
}
  0x49   : > { %504 = dma.hbm_to_vmem [thread:$0]  (!%p817_p0), %s862_s16, 64, %s165_s19, %s153_s30  }
  0x4a   : > { %p972_p13 = scmp.ne.s32.totalorder %s971_s7, 0 }
  0x4b   : > { %s889_s15 = sand.u32 (!%p972_p13), 1, %s696_s10   ;;  %p973_p5 = scmp.ne.s32.totalorder (!%p972_p13), %s965_s21, 0 }
  0x4c   : > { %173 = sbr.rel (%p972_p13) target bundleno = 816 (0x330), region = 28  ;;  %s474_s18 = sshll.u32 (!%p972_p13), %s889_s15, 2 }
  0x4d   : > { %s176_s4 = scalar_lea.sflag (!%p972_p13), [#allocation4], %s889_s15  ;;  %s179_s6 = scalar_lea.vmem (!%p972_p13), [#allocation3], %s474_s18 }
  0x53   : > { %679 = dma.done.wait (%p973_p5), %s176_s4, 64  }
  0x54   : > { %681 = vsyncadd (%p973_p5), %s176_s4, 4294967232  ;;  %s185_s5 = scalar_lea.sflag [#allocation7], %s889_s15  ;;  %s188_s16 = scalar_lea.vmem [#allocation6], %s474_s18 }
  0x55   : > { %683 = dma.done.wait (%p973_p5), %s185_s5, 64  }
  0x56   : > { %685 = vsyncadd (%p973_p5), %s185_s5, 4294967232  ;;  %vm218_vm0 = vcmask 64512   ;;  %v716_v0 = vmov 0.0   ;;  %vm717_vm1 = vmmov 0   ;;  %v220_v1 = vld [vmem:[%s179_s6] sm:$0xf]  ;;  %v309_v7 = vlaneseq }
  0x57   : > { %219 = vst.msk [vmem:[#allocation2] sm:$0xff] %vm218_vm0, %v716_v0  ;;  %485 = vmatprep.subr.mxu0 %v716_v0  ;;  %487 = vmatprep.mubr.msk.f32.mxu0 %vm717_vm1, %v716_v0  ;;  %v221_v2 = vld [vmem:[%s188_s16] sm:$0xf]  ;;  %vm225_vm2 = vcmask 1043456   ;;  %vm228_vm3 = vcmask 31744   ;;  %s718_s21 = smov 124  }
  0x58   : > { %v223_v3 = vrot.slane %v221_v2, 4  ;;  %v310_v10 = vshrl.u32 %v309_v7, 7  ;;  %v312_v11 = vand.u32 127, %v309_v7  ;;  %vm335_vm5 = vcmask 27648   ;;  %s476_s7 = sshll.u32 %s889_s15, 3  ;;  %s480_s20 = sshll.u32 %s704_s12, 7 }
  0x59   : > { %s213_s19 = scalar_lea.vmem [#allocation8], %s476_s7  ;;  %s912_s25 = scalar_lea.hbm %s961_s2, %s480_s20 }
  0x5a   : > { %v226_v4 = vsel %vm225_vm2, %v220_v1, %v223_v3  ;;  %vm313_vm4 = vcmp.eq.s32.totalorder %v310_v10, %v312_v11  ;;  %s362_s30 = sshll.u32 %s213_s19, 4  ;;  %s349_s26 = scalar_lea.sflag [#allocation5], %s889_s15  ;;  %s907_s30 = int_to_ptr.vmem [resolvable:$true] %s362_s30 }
  0x5b   : > { %486 = vmatpush3.xpose.msk.msra.mxu0 %vm228_vm3, %v226_v4  ;;  %s626_s3 = scalar_lea.vmem %s907_s30, 128  ;;  %p974_p0 = scmp.ne.s32.totalorder %s966_s22, 0 }
  0x5c   : > { %p627_p8 = scmp.ne.s32.totalorder %s907_s30, %s626_s3  ;;  %s719_s12 = smov [#allocation8]  }
  0x5d   : > { %s630_s8 = sshll.u32 %s719_s12, 4  ;;  %s631_s8 = int_to_ptr.vmem [resolvable:$false] %s630_s8 }
  0x5e   : > { %488 = vmatmul.mubr.msk.f32.vlgmr.msra.gmra.mrb[0].mxu0 %vm228_vm3, %v226_v4  ;;  %v227_v5 = vld [vmem:[#allocation2] sm:$0xff]  ;;  %p628_p7 = pnand %p627_p8, %p974_p0  ;;  %s632_s18 = scalar_lea.vmem %s631_s8, 256 }
  0x5f   : > { %p633_p10 = scmp.lt.s32.totalorder %s907_s30, %s631_s8  ;;  %p634_p12 = scmp.lt.s32.totalorder %s632_s18, %s626_s3 }
  0x60   : > { %p629_p4 = pneg %p628_p7 }
  0x61   : > { %p635_p1 = por %p634_p12, %p633_p10 }
  0x63   : > { %p636_p2 = pnand %p635_p1, %p629_p4 }
 0x131   : > { %v298_v6 = vpop.f32.mrb[0].mxu0 }
 0x132   : > { %v302_v8 = vadd.f32 %v298_v6, %v227_v5  ;;  %v489_v9 = vpop.f32.mrb[1].mxu0 }
 0x134   : > { %304 = vst.msk [vmem:[#allocation2] sm:$0xff] %vm218_vm0, %v302_v8 }
 0x13b   : > { %v308_v12 = vld [vmem:[#allocation2] sm:$0xff] }
 0x13c   : > { %v314_v13 = vsel %vm313_vm4, %v308_v12, 0.0 }
 0x13d   : > { %v315_v14 = vsel %vm218_vm0, %v314_v13, 0.0 }
 0x13e   : > { %316 = vadd.xlane.f32.xlu0 %v315_v14  ;;  %v319_v15 = vrot.slane %v315_v14, 4 }
 0x140   : > { %v320_v16 = vadd.f32 %v319_v15, %v315_v14 }
 0x142   : > { %v321_v17 = vrot.slane %v320_v16, 2 }
 0x144   : > { %v322_v18 = vadd.f32 %v321_v17, %v320_v16 }
 0x146   : > { %v323_v19 = vrot.slane %v322_v18, 1 }
 0x148   : > { %v324_v20 = vadd.f32 %v323_v19, %v322_v18 }
 0x14a   : > { %562 = vrsqrt.f32 %v324_v20 }
 0x154   : > { %v563_v22 = vpop.eup %562 }
 0x1cb   : > { %v317_v21 = vpop.xlane.xlu0 %316 }
 0x1cc   : > { %564 = vrsqrt.f32 %v317_v21 }
 0x1d6   : > { %v565_v23 = vpop.eup %564 }
 0x1d7   : > { %v326_v24 = vmul.f32 %v565_v23, %v563_v22 }
 0x1d9   : > { %v327_v25 = vmul.f32 %v326_v24, %v308_v12 }
 0x1db   : > { %v329_v26 = vrot.slane %v327_v25, 4 }
 0x1dd   : > { %330 = vrot.lane.b32.xlu0 %v329_v26, %s718_s21 }
 0x24f   : > { %v331_v27 = vpop.permute.xlu0 %330 }
 0x250   : > { %v333_v28 = vsub.f32 %v327_v25, %v331_v27 }
 0x252   : > { %v334_v29 = vand.u32 2147483647, %v333_v28 }
 0x254   : > { %v336_v30 = vsel %vm335_vm5, %v334_v29, 0.0 }
 0x255   : > { %337 = vadd.xlane.f32.xlu1 %v336_v30 }
 0x2e2   : > { %v338_v31 = vpop.xlane.xlu1 %337 }
 0x2e3   : > { %v339_v32 = vrot.slane %v338_v31, 4 }
 0x2e5   : > { %v340_v33 = vadd.f32 %v339_v32, %v338_v31 }
 0x2e7   : > { %v341_v34 = vrot.slane %v340_v33, 2 }
 0x2e9   : > { %v342_v35 = vadd.f32 %v341_v34, %v340_v33 }
 0x2eb   : > { %v343_v36 = vrot.slane %v342_v35, 1 }
 0x2ed   : > { %v344_v37 = vadd.f32 %v343_v36, %v342_v35 }
 0x2ef   : > { %490 = vpush %v344_v37 }
 0x320   : > { %s491_s27 = spop %490 }
 0x321   : > { %v346_v38 = vstv %s491_s27 }
 0x322   : > { %347 = vst [vmem:[%s213_s19] sm:$0xff] %v346_v38 }
 0x323   : > { %639 = shalt.err (!%p636_p2)
}
 0x324   : > { %s640_s15 = scalar_lea.hbm %s912_s25, 128  ;;  %s644_s5 = scalar_lea.hbm %s961_s2, 256 }
 0x325   : > { %p641_p9 = scmp.ne.s32.totalorder %s912_s25, %s640_s15  ;;  %p645_p6 = scmp.lt.u32.totalorder %s912_s25, %s961_s2 }
 0x326   : > { %p646_p13 = scmp.lt.u32.totalorder %s644_s5, %s640_s15  ;;  %p648_p8 = scmp.lt.u32.totalorder %s640_s15, %s912_s25 }
 0x327   : > { %p642_p11 = pnand %p641_p9, %p974_p0 }
 0x328   : > { %p647_p5 = por %p646_p13, %p645_p6 }
 0x329   : > { %p643_p3 = pneg %p642_p11 }
 0x32a   : > { %p649_p7 = por %p648_p8, %p647_p5 }
 0x32c   : > { %p650_p4 = pnand %p649_p7, %p643_p3 }
 0x32e   : > { %653 = shalt.err (!%p650_p4)
}
 0x32f   : > { %496 = dma.vmem_to_hbm [thread:$0]  (%p974_p0), %s907_s30, 128, %s912_s25, %s349_s26  }
 0x330 PF: > { %s374_s7 = sand.u32 1, %s692_s9   ;;  %p975_p10 = scmp.ne.s32.totalorder %s967_s24, 0 }
 0x331   : > { %p976_p12 = scmp.ge.s32.totalorder %s712_s14, 2  ;;  %s375_s19 = scalar_lea.sflag [#allocation5], %s374_s7 }
 0x333   : > { %p506_p1 = pnand %p976_p12, %p975_p10 }
 0x335   : > { %687 = dma.done.wait (!%p506_p1), %s375_s19, 128  }
 0x336   : > { %689 = vsyncadd (!%p506_p1), %s375_s19, 4294967168  ;;  %s21_s14 = sadd.s32 1, %s712_s14   ;;  %s977_s9 = smov %s696_s10 }
 0x337   : > { %p18_p2 = scmp.ge.s32.totalorder %s21_s14, 4   ;;  %s978_s10 = smov %s700_s11 }
 0x338   : > { %s979_s11 = smov %s791_s23  ;;  %s980_s12 = smov %s708_s13 }
 0x339   : > { %s981_s13 = smov %s983_s17  ;;  %20 = sbr.rel (!%p18_p2) target bundleno = 8 (0x8), region = 94 }
 0x340   :  { %380 = vsyncpa [#allocation4], 1 }
 0x341   :  { %382 = vsyncpa [#allocation4 + $0x1], 1 }
 0x342   :  { %383 = vsyncpa [#allocation7], 1 }
 0x343   :  { %385 = vsyncpa [#allocation7 + $0x1], 1 }
 0x344   :  { %386 = vsyncpa [#allocation5], 1 }
 0x345   :  { %388 = vsyncpa [#allocation5 + $0x1], 1 }

</bundles_post_ra>
